<compile_context>
chip_gen: v7x
topology: tpu7x:2x2x1
jax: 0.10.0
libtpu: 0.0.40
codegen_flags: <defaults>
</compile_context>

<pallas_src>
import jax
import jax.numpy as jnp
from jax import lax
from jax.experimental import pallas as pl
from jax.experimental.pallas import tpu as pltpu

# ----- padded / packed layout constants ------------------------------------
IN_DIM = 4          # real input features
IN_PAD = 8          # x padded to 8 (sublane-friendly K for fc1)
HIDDEN = 128        # hidden 100 padded to 128 lanes
OUT_DIM = 2         # real classes
OUT_PAD = 8         # narrow output slab (block last dim == full array dim)

# row layout of the single packed parameter buffer (272, 128), f32:
#   [  0:  8)  W1 padded  (4,100)  -> (8,128)
#   [  8:136)  W2 padded (100,100) -> (128,128)
#   [136:264)  W3 padded (100,  2) -> (128,128)
#   [264:272)  biases: row0=b1, row1=b2, row2=b3 (each padded to 128 lanes)
P_ROWS = 272


def _round_up(n, m):
    return ((n + m - 1) // m) * m


# ----- kernel ---------------------------------------------------------------
def _make_kernel(use_bf16_matmul: bool):
    def mlp_kernel(x_ref, p_ref, o_ref):
        x = x_ref[...]                       # (tm, IN_PAD) f32

        # static, tile-aligned slices of the packed parameter buffer
        w1 = p_ref[0:8, :]                   # (8, 128)
        w2 = p_ref[8:136, :]                 # (128, 128)
        w3 = p_ref[136:264, :]               # (128, 128)
        biases = p_ref[264:272, :]           # (8, 128)
        b1 = biases[0:1, :]
        b2 = biases[1:2, :]
        b3 = biases[2:3, :]

        def mm(a, b, bf16):
            if bf16:
                a = a.astype(jnp.bfloat16)
                b = b.astype(jnp.bfloat16)
            return jnp.dot(a, b, preferred_element_type=jnp.float32)

        # fc1 / fc2 / fc3 + ReLU (MXU matmuls, f32 accumulate).  fc1 stays f32
        # even under the bf16 flag (tiny K, keeps input precision).
        h1 = jnp.maximum(mm(x, w1, False) + b1, 0.0)
        h2 = jnp.maximum(mm(h1, w2, use_bf16_matmul) + b2, 0.0)
        h3 = jnp.maximum(mm(h2, w3, use_bf16_matmul) + b3, 0.0)

        # Exact 2-class softmax in closed form (no approx reciprocal, no
        # 128-lane masked reductions).  Overflow-safe: exp->inf gives p0=0.
        l0 = h3[:, 0:1]                      # (tm, 1)
        l1 = h3[:, 1:2]                      # (tm, 1)
        p0 = 1.0 / (1.0 + jnp.exp(l1 - l0))  # softmax prob of class 0
        p1 = 1.0 - p0                        # class 1; sums to 1 exactly

        lane = lax.broadcasted_iota(jnp.int32, (x.shape[0], OUT_PAD), 1)
        o_ref[...] = jnp.where(lane == 0, p0,
                               jnp.where(lane == 1, p1, jnp.float32(0.0)))

    return mlp_kernel


# ----- wrapper --------------------------------------------------------------
def net_forward(x, params, *, tile_m=1024, use_bf16_matmul=False):
    """x: (B, 4) float32. params: {"packed": (272,128) f32}. Returns (B, 2)."""
    B = x.shape[0]
    packed = params["packed"]

    b_eff = max(B, 1)
    # Small B -> one near-exact tile (<=7 dead pad rows); large B -> >=2 tiles
    # so both v7x TensorCores get work along the "parallel" batch axis.
    tm = min(tile_m, _round_up(pl.cdiv(b_eff, 2), 8))
    tm = max(tm, 8)
    bp = _round_up(b_eff, tm)
    grid_m = bp // tm

    # pad batch rows (zeros) and feature dim 4 -> 8 (zeros); exact padding
    x_pad = jnp.zeros((bp, IN_PAD), jnp.float32).at[:B, :IN_DIM].set(
        x.astype(jnp.float32))

    cost = pl.CostEstimate(
        flops=2 * bp * (IN_PAD * HIDDEN + HIDDEN * HIDDEN + HIDDEN * HIDDEN),
        transcendentals=bp,                       # one exp per row
        bytes_accessed=bp * (IN_PAD + OUT_PAD) * 4 + P_ROWS * HIDDEN * 4,
    )

    out_padded = pl.pallas_call(
        _make_kernel(use_bf16_matmul),
        out_shape=jax.ShapeDtypeStruct((bp, OUT_PAD), jnp.float32),
        grid=(grid_m,),
        in_specs=[
            pl.BlockSpec((tm, IN_PAD), lambda i: (i, 0)),
            # constant index_map -> packed params stay VMEM-resident
            pl.BlockSpec((P_ROWS, HIDDEN), lambda i: (0, 0)),
        ],
        out_specs=pl.BlockSpec((tm, OUT_PAD), lambda i: (i, 0)),
        compiler_params=pltpu.CompilerParams(
            dimension_semantics=("parallel",)),
        cost_estimate=cost,
    )(x_pad, packed)

    return out_padded[:B, :OUT_DIM]


# ----- parameter init / packing / reference ---------------------------------
def init_raw_params(key):
    """PyTorch nn.Linear-style init, stored as (in,out) weights, (1,out) biases."""
    dims = [(IN_DIM, 100), (100, 100), (100, OUT_DIM)]
    raw = {}
    for idx, (fan_in, fan_out) in enumerate(dims, start=1):
        key, kw, kb = jax.random.split(key, 3)
        bound = 1.0 / jnp.sqrt(jnp.float32(fan_in))
        raw[f"w{idx}"] = jax.random.uniform(kw, (fan_in, fan_out), jnp.float32,
                                            -bound, bound)
        raw[f"b{idx}"] = jax.random.uniform(kb, (1, fan_out), jnp.float32,
                                            -bound, bound)
    return raw


def pack_params(raw):
    """Zero-pad and concatenate all params into one (272, 128) f32 buffer."""
    w1p = jnp.zeros((8, HIDDEN), jnp.float32).at[:IN_DIM, :100].set(raw["w1"])
    w2p = jnp.zeros((HIDDEN, HIDDEN), jnp.float32).at[:100, :100].set(raw["w2"])
    w3p = jnp.zeros((HIDDEN, HIDDEN), jnp.float32).at[:100, :OUT_DIM].set(raw["w3"])
    bp = jnp.zeros((8, HIDDEN), jnp.float32)
    bp = bp.at[0, :100].set(raw["b1"][0])
    bp = bp.at[1, :100].set(raw["b2"][0])
    bp = bp.at[2, :OUT_DIM].set(raw["b3"][0])
    packed = jnp.concatenate([w1p, w2p, w3p, bp], axis=0)
    assert packed.shape == (P_ROWS, HIDDEN)
    return {"packed": packed}


def reference_forward(x, raw):
    """Pure-JAX reference on the unpadded parameters."""
    h = jnp.maximum(x @ raw["w1"] + raw["b1"], 0.0)
    h = jnp.maximum(h @ raw["w2"] + raw["b2"], 0.0)
    h = jnp.maximum(h @ raw["w3"] + raw["b3"], 0.0)
    return jax.nn.softmax(h, axis=1)


# ----- main -----------------------------------------------------------------
if __name__ == "__main__":
    key = jax.random.PRNGKey(0)
    key, kx1, kx2 = jax.random.split(key, 3)

    raw = init_raw_params(key)
    params = pack_params(raw)

    # small batch (single grid tile)
    B1 = 8
    x1 = jax.random.normal(kx1, (B1, IN_DIM), jnp.float32)
    out1 = jax.block_until_ready(net_forward(x1, params))
    ref1 = reference_forward(x1, raw)
    assert out1.shape == (B1, OUT_DIM)
    assert jnp.allclose(out1, ref1, atol=1e-4, rtol=1e-4), "mismatch (B=8)"
    assert jnp.allclose(jnp.sum(out1, axis=1), jnp.ones((B1,)), atol=1e-4)

    # larger, non-multiple-of-8 batch (exercises 2-tile grid + padding path)
    B2 = 300
    x2 = jax.random.normal(kx2, (B2, IN_DIM), jnp.float32)
    out2 = jax.block_until_ready(net_forward(x2, params))
    ref2 = reference_forward(x2, raw)
    assert out2.shape == (B2, OUT_DIM)
    assert jnp.allclose(out2, ref2, atol=1e-4, rtol=1e-4), "mismatch (B=300)"
    assert jnp.allclose(jnp.sum(out2, axis=1), jnp.ones((B2,)), atol=1e-4)

    print("KERNEL_OK")
</pallas_src>

<mosaic_0001>
module attributes {stable_mosaic.version = 11 : i64} {
  func.func @mlp_kernel(%arg0: i32, %arg1: memref<8x8xf32, #tpu.memory_space<vmem>>, %arg2: memref<272x128xf32, #tpu.memory_space<vmem>>, %arg3: memref<8x8xf32, #tpu.memory_space<vmem>>) attributes {dimension_semantics = [#tpu.dimension_semantics<parallel>], iteration_bounds = array<i64: 1>, scalar_prefetch = 0 : i64, scratch_operands = 0 : i64, tpu.core_type = #tpu.core_type<tc>, window_params = [{transform_indices = @transform_0, window_bounds = array<i64: 8, 8>}, {pipeline_mode = #tpu.pipeline_mode<synchronous>, transform_indices = @transform_1, window_bounds = array<i64: 272, 128>}, {transform_indices = @transform_2, window_bounds = array<i64: 8, 8>}]} {
    %c0 = arith.constant 0 : index
    %c0_0 = arith.constant 0 : index
    %0 = vector.load %arg1[%c0, %c0_0] : memref<8x8xf32, #tpu.memory_space<vmem>>, vector<8x8xf32>
    %c0_1 = arith.constant 0 : index
    %c0_2 = arith.constant 0 : index
    %1 = vector.load %arg2[%c0_1, %c0_2] : memref<272x128xf32, #tpu.memory_space<vmem>>, vector<8x128xf32>
    %c8 = arith.constant 8 : index
    %c0_3 = arith.constant 0 : index
    %2 = vector.load %arg2[%c8, %c0_3] : memref<272x128xf32, #tpu.memory_space<vmem>>, vector<128x128xf32>
    %c136 = arith.constant 136 : index
    %c0_4 = arith.constant 0 : index
    %3 = vector.load %arg2[%c136, %c0_4] : memref<272x128xf32, #tpu.memory_space<vmem>>, vector<128x128xf32>
    %c264 = arith.constant 264 : index
    %c0_5 = arith.constant 0 : index
    %4 = vector.load %arg2[%c264, %c0_5] : memref<272x128xf32, #tpu.memory_space<vmem>>, vector<8x128xf32>
    %5 = vector.extract_strided_slice %4 {offsets = [0, 0], sizes = [1, 128], strides = [1, 1]} : vector<8x128xf32> to vector<1x128xf32>
    %6 = vector.extract_strided_slice %4 {offsets = [1, 0], sizes = [1, 128], strides = [1, 1]} : vector<8x128xf32> to vector<1x128xf32>
    %7 = vector.extract_strided_slice %4 {offsets = [2, 0], sizes = [1, 128], strides = [1, 1]} : vector<8x128xf32> to vector<1x128xf32>
    %cst = arith.constant dense<0.000000e+00> : vector<8x128xf32>
    %8 = tpu.matmul %0, %1, %cst {dimension_numbers = #tpu.dot_dimension_numbers<[1], [0], [0], [1], [0, 0, 1, 1], [], []>} : vector<8x8xf32>, vector<8x128xf32>, vector<8x128xf32> -> vector<8x128xf32>
    %9 = vector.broadcast %5 : vector<1x128xf32> to vector<8x128xf32>
    %10 = arith.addf %8, %9 : vector<8x128xf32>
    %cst_6 = arith.constant 0.000000e+00 : f32
    %11 = vector.broadcast %cst_6 : f32 to vector<8x128xf32>
    %12 = arith.maximumf %10, %11 : vector<8x128xf32>
    %cst_7 = arith.constant dense<0.000000e+00> : vector<8x128xf32>
    %13 = tpu.matmul %12, %2, %cst_7 {dimension_numbers = #tpu.dot_dimension_numbers<[1], [0], [0], [1], [0, 0, 1, 1], [], []>} : vector<8x128xf32>, vector<128x128xf32>, vector<8x128xf32> -> vector<8x128xf32>
    %14 = vector.broadcast %6 : vector<1x128xf32> to vector<8x128xf32>
    %15 = arith.addf %13, %14 : vector<8x128xf32>
    %cst_8 = arith.constant 0.000000e+00 : f32
    %16 = vector.broadcast %cst_8 : f32 to vector<8x128xf32>
    %17 = arith.maximumf %15, %16 : vector<8x128xf32>
    %cst_9 = arith.constant dense<0.000000e+00> : vector<8x128xf32>
    %18 = tpu.matmul %17, %3, %cst_9 {dimension_numbers = #tpu.dot_dimension_numbers<[1], [0], [0], [1], [0, 0, 1, 1], [], []>} : vector<8x128xf32>, vector<128x128xf32>, vector<8x128xf32> -> vector<8x128xf32>
    %19 = vector.broadcast %7 : vector<1x128xf32> to vector<8x128xf32>
    %20 = arith.addf %18, %19 : vector<8x128xf32>
    %cst_10 = arith.constant 0.000000e+00 : f32
    %21 = vector.broadcast %cst_10 : f32 to vector<8x128xf32>
    %22 = arith.maximumf %20, %21 : vector<8x128xf32>
    %23 = vector.extract_strided_slice %22 {offsets = [0, 0], sizes = [8, 1], strides = [1, 1]} : vector<8x128xf32> to vector<8x1xf32>
    %24 = vector.extract_strided_slice %22 {offsets = [0, 1], sizes = [8, 1], strides = [1, 1]} : vector<8x128xf32> to vector<8x1xf32>
    %25 = arith.subf %24, %23 : vector<8x1xf32>
    %26 = math.exp %25 : vector<8x1xf32>
    %cst_11 = arith.constant 1.000000e+00 : f32
    %27 = vector.broadcast %cst_11 : f32 to vector<8x1xf32>
    %28 = arith.addf %27, %26 : vector<8x1xf32>
    %cst_12 = arith.constant 1.000000e+00 : f32
    %29 = vector.broadcast %cst_12 : f32 to vector<8x1xf32>
    %30 = arith.divf %29, %28 : vector<8x1xf32>
    %cst_13 = arith.constant 1.000000e+00 : f32
    %31 = vector.broadcast %cst_13 : f32 to vector<8x1xf32>
    %32 = arith.subf %31, %30 : vector<8x1xf32>
    %33 = tpu.iota {dimensions = array<i32: 1>} : vector<8x8xi32>
    %c0_i32 = arith.constant 0 : i32
    %34 = vector.broadcast %c0_i32 : i32 to vector<8x8xi32>
    %35 = arith.cmpi eq, %33, %34 : vector<8x8xi32>
    %c1_i32 = arith.constant 1 : i32
    %36 = vector.broadcast %c1_i32 : i32 to vector<8x8xi32>
    %37 = arith.cmpi eq, %33, %36 : vector<8x8xi32>
    %cst_14 = arith.constant 0.000000e+00 : f32
    %38 = vector.shape_cast %32 : vector<8x1xf32> to vector<8x1xf32>
    %39 = vector.broadcast %38 : vector<8x1xf32> to vector<8x8xf32>
    %40 = vector.broadcast %cst_14 : f32 to vector<8x8xf32>
    %41 = arith.select %37, %39, %40 : vector<8x8xi1>, vector<8x8xf32>
    %42 = vector.shape_cast %30 : vector<8x1xf32> to vector<8x1xf32>
    %43 = vector.broadcast %42 : vector<8x1xf32> to vector<8x8xf32>
    %44 = arith.select %35, %43, %41 : vector<8x8xi1>, vector<8x8xf32>
    %c0_15 = arith.constant 0 : index
    %c0_16 = arith.constant 0 : index
    %45 = vector.load %arg3[%c0_15, %c0_16] : memref<8x8xf32, #tpu.memory_space<vmem>>, vector<8x8xf32>
    tpu.vector_store %arg3[%c0_15, %c0_16], %44 {strides = array<i32>} : memref<8x8xf32, #tpu.memory_space<vmem>>, vector<8x8xf32>,
    return
  }
  func.func @transform_0(%arg0: i32) -> (i32, i32) {
    %c0_i32 = arith.constant 0 : i32
    %c0_i32_0 = arith.constant 0 : i32
    return %arg0, %c0_i32 : i32, i32
  }
  func.func @transform_1(%arg0: i32) -> (i32, i32) {
    %c0_i32 = arith.constant 0 : i32
    %c0_i32_0 = arith.constant 0 : i32
    %c0_i32_1 = arith.constant 0 : i32
    return %c0_i32, %c0_i32_0 : i32, i32
  }
  func.func @transform_2(%arg0: i32) -> (i32, i32) {
    %c0_i32 = arith.constant 0 : i32
    %c0_i32_0 = arith.constant 0 : i32
    return %arg0, %c0_i32 : i32, i32
  }
}

</mosaic_0001>

<bundles_post_ra>
// kernel: tpu_custom_call.1
= control target key start
LH: loop header
LB: loop body
LE: loop exit
PB: predicated region body
PF: predicated region fallthrough
CT: control target
= control target key end

     0   :  { %7 = vsyncpa [#allocation3], 0  ;;  %s683_s0 = inlined_call_operand.hbm [shape: f32[8,8], index: 0, kind: input, shape index: {}]   ;;  %s684_s1 = inlined_call_operand.hbm [shape: f32[272,128], index: 1, kind: input, shape index: {}]   ;;  %s685_s2 = inlined_call_operand.hbm [shape: f32[8,8], index: 2, kind: output, shape index: {}]  }
   0x1   :  { %8 = vsyncpa [#allocation6], 0 }
   0x2   :  { %9 = vsyncpa [#allocation4], 0  ;;  %s594_s9 = smov [#allocation2]   ;;  %s595_s11 = smov [#allocation5]  }
   0x3   :  { %s16_s10 = sshll.u32 %s594_s9, 4  ;;  %s25_s12 = sshll.u32 %s595_s11, 4  ;;  %s17_s10 = int_to_ptr.vmem [resolvable:$true] %s16_s10  ;;  %s619_s12 = int_to_ptr.vmem [resolvable:$true] %s25_s12 }
   0x4   :  { %s522_s15 = scalar_lea.hbm %s683_s0, 128 }
   0x5   :  { %p523_p0 = scmp.ne.s32.totalorder %s683_s0, %s522_s15  ;;  %p526_p1 = scmp.lt.u32.totalorder %s522_s15, %s683_s0 }
   0x7   :  { %p528_p2 = pnand %p526_p1, %p523_p0 }
   0x9   :  { %531 = shalt.err (!%p528_p2)
}
   0xa   :  { %s532_s20 = scalar_lea.vmem %s17_s10, 128  ;;  %p537_p4 = scmp.lt.s32.totalorder %s17_s10, %s17_s10 }
   0xb   :  { %p533_p3 = scmp.ne.s32.totalorder %s17_s10, %s532_s20  ;;  %p538_p5 = scmp.lt.s32.totalorder %s532_s20, %s532_s20 }
   0xd   :  { %p539_p6 = por %p538_p5, %p537_p4 }
   0xf   :  { %p540_p7 = pnand %p539_p6, %p533_p3 }
  0x11   :  { %543 = shalt.err (!%p540_p7)
}
  0x12   :  { %19 = dma.hbm_to_vmem [thread:$0]  %s683_s0, 128, %s17_s10, [#allocation3]  }
  0x13   :  { %s544_s25 = scalar_lea.hbm %s684_s1, 4352 }
  0x14   :  { %p545_p8 = scmp.ne.s32.totalorder %s684_s1, %s544_s25  ;;  %p548_p9 = scmp.lt.u32.totalorder %s544_s25, %s684_s1 }
  0x16   :  { %p550_p10 = pnand %p548_p9, %p545_p8 }
  0x18   :  { %553 = shalt.err (!%p550_p10)
}
  0x19   :  { %s554_s30 = scalar_lea.vmem %s619_s12, 4352  ;;  %p559_p12 = scmp.lt.s32.totalorder %s619_s12, %s619_s12 }
  0x1a   :  { %p555_p11 = scmp.ne.s32.totalorder %s619_s12, %s554_s30  ;;  %p560_p13 = scmp.lt.s32.totalorder %s554_s30, %s554_s30 }
  0x1c   :  { %p561_p0 = por %p560_p13, %p559_p12 }
  0x1e   :  { %p562_p1 = pnand %p561_p0, %p555_p11 }
  0x20   :  { %565 = shalt.err (!%p562_p1)
}
  0x21   :  { %s596_s0 = smov 128   ;;  %s597_s3 = smov 8  }
  0x22   :  { %31 = dma.hbm_to_vmem [thread:$0]  %s684_s1, 4352, %s619_s12, [#allocation6], %s596_s0, %s596_s0, %s597_s3  }
  0x23   :  { %588 = dma.done.wait [#allocation3], 128  }
  0x24   :  { %589 = vsyncadd [#allocation3], 4294967168 }
  0x25   :  { %590 = dma.done.wait [#allocation6], 4352  }
  0x26   :  { %591 = vsyncadd [#allocation6], 4294962944  ;;  %v598_v0 = vmov 0.0   ;;  %vm599_vm0 = vmmov 0   ;;  %v600_v1 = vmov 0.0|0.0   ;;  %vm77_vm1 = vcmask 64512  }
  0x27   :  { %383 = vmatprep.subr.mxu0 %v598_v0  ;;  %385 = vmatprep.mubr.msk.f32.mxu0 %vm599_vm0, %v598_v0  ;;  %v39_v2 = vld [vmem:[#allocation5] sm:$0xff]  ;;  %v38_v3 = vld [vmem:[#allocation2] sm:$0xff]  ;;  %v40_v4 = vld [vmem:[#allocation5 + $0x8] sm:$0xff]  ;;  %v73_v49 = vlaneseq  ;;  %s601_s1 = smov 1   ;;  %s603_s6 = smov [#allocation7]  }
  0x28   :  { %458 = vmatprep.subr.bf16.mxu1 %v600_v1  ;;  %420 = vmatprep.mubr.msk.f32.mxu1 %vm599_vm0, %v598_v0  ;;  %v41_v5 = vld [vmem:[#allocation5 + $0x10] sm:$0xff]  ;;  %v42_v6 = vld [vmem:[#allocation5 + $0x18] sm:$0xff]  ;;  %v43_v7 = vld [vmem:[#allocation5 + $0x20] sm:$0xff]  ;;  %s336_s7 = sshll.u32 %s603_s6, 4  ;;  %s337_s7 = int_to_ptr.vmem [resolvable:$true] %s336_s7 }
  0x29   :  { %384 = vmatpush3.msra.mxu0 %v39_v2  ;;  %v459_v8 = vpack.c.bf16 %v41_v5, %v40_v4  ;;  %v462_v9 = vpack.c.bf16 %v43_v7, %v42_v6  ;;  %v44_v10 = vld [vmem:[#allocation5 + $0x28] sm:$0xff]  ;;  %v45_v11 = vld [vmem:[#allocation5 + $0x30] sm:$0xff]  ;;  %v46_v13 = vld [vmem:[#allocation5 + $0x38] sm:$0xff]  ;;  %v74_v50 = vshrl.u32 %v73_v49, 7  ;;  %s566_s8 = scalar_lea.vmem %s337_s7, 128  ;;  %p571_p3 = scmp.lt.s32.totalorder %s337_s7, %s337_s7 }
  0x2a   :  { %386 = vmatmul.mubr.msk.f32.vlgmr.msra.gmra.mrb[0].mxu0 %vm77_vm1, %v38_v3  ;;  %482 = vmatprep.subr.bf16.mxu0 %v600_v1  ;;  %v465_v12 = vpack.c.bf16 %v45_v11, %v44_v10  ;;  %v47_v14 = vld [vmem:[#allocation5 + $0x40] sm:$0xff]  ;;  %v48_v16 = vld [vmem:[#allocation5 + $0x48] sm:$0xff]  ;;  %v49_v17 = vld [vmem:[#allocation5 + $0x50] sm:$0xff]  ;;  %p567_p2 = scmp.ne.s32.totalorder %s337_s7, %s566_s8  ;;  %p572_p4 = scmp.lt.s32.totalorder %s566_s8, %s566_s8 }
  0x2b   :  { %455 = vmatprep.mubr.msk.f32.mxu0 %vm599_vm0, %v598_v0  ;;  %460 = vmatpush3.bf16.msra.mxu1 %v459_v8  ;;  %v468_v15 = vpack.c.bf16 %v47_v14, %v46_v13  ;;  %v471_v18 = vpack.c.bf16 %v49_v17, %v48_v16  ;;  %v50_v19 = vld [vmem:[#allocation5 + $0x58] sm:$0xff]  ;;  %v51_v20 = vld [vmem:[#allocation5 + $0x60] sm:$0xff]  ;;  %v52_v22 = vld [vmem:[#allocation5 + $0x68] sm:$0xff]  ;;  %v75_v51 = vsub.s32 0, %v74_v50  ;;  %v154_v61 = vsub.s32 1, %v74_v50 }
  0x2c   :  { %461 = vmatprep.subr.bf16.mxu1 %v600_v1  ;;  %v474_v21 = vpack.c.bf16 %v51_v20, %v50_v19  ;;  %v53_v23 = vld [vmem:[#allocation5 + $0x70] sm:$0xff]  ;;  %v54_v25 = vld [vmem:[#allocation5 + $0x78] sm:$0xff]  ;;  %v55_v26 = vld [vmem:[#allocation5 + $0x80] sm:$0xff]  ;;  %v229_v3 = vsub.s32 2, %v74_v50  ;;  %v314_v17 = vand.u32 127, %v73_v49  ;;  %p573_p5 = por %p572_p4, %p571_p3 }
  0x2d   :  { %v477_v24 = vpack.c.bf16 %v53_v23, %v52_v22  ;;  %v480_v27 = vpack.c.bf16 %v55_v26, %v54_v25  ;;  %v56_v28 = vld [vmem:[#allocation5 + $0x88] sm:$0xff]  ;;  %v57_v29 = vld [vmem:[#allocation5 + $0x90] sm:$0xff]  ;;  %v58_v30 = vld [vmem:[#allocation5 + $0x98] sm:$0xff] }
  0x2e   :  { %v483_v31 = vpack.c.bf16 %v57_v29, %v56_v28  ;;  %v59_v32 = vld [vmem:[#allocation5 + $0xa0] sm:$0xff]  ;;  %v60_v34 = vld [vmem:[#allocation5 + $0xa8] sm:$0xff]  ;;  %v61_v35 = vld [vmem:[#allocation5 + $0xb0] sm:$0xff]  ;;  %vm316_vm2 = vcmp.eq.s32.totalorder %v314_v17, 1  ;;  %vm315_vm3 = vcmp.eq.s32.totalorder %v314_v17, 0  ;;  %p574_p6 = pnand %p573_p5, %p567_p2 }
  0x2f   :  { %463 = vmatpush3.bf16.msra.mxu1 %v462_v9  ;;  %v486_v33 = vpack.c.bf16 %v59_v32, %v58_v30  ;;  %v489_v36 = vpack.c.bf16 %v61_v35, %v60_v34  ;;  %v62_v37 = vld [vmem:[#allocation5 + $0xb8] sm:$0xff]  ;;  %v63_v38 = vld [vmem:[#allocation5 + $0xc0] sm:$0xff]  ;;  %v64_v40 = vld [vmem:[#allocation5 + $0xc8] sm:$0xff]  ;;  %v602_v9 = vmov 1  }
  0x30   :  { %464 = vmatprep.subr.bf16.mxu1 %v600_v1  ;;  %484 = vmatpush3.bf16.msra.mxu0 %v483_v31  ;;  %v492_v39 = vpack.c.bf16 %v63_v38, %v62_v37  ;;  %v65_v41 = vld [vmem:[#allocation5 + $0xd0] sm:$0xff]  ;;  %v66_v43 = vld [vmem:[#allocation5 + $0xd8] sm:$0xff]  ;;  %v67_v44 = vld [vmem:[#allocation5 + $0xe0] sm:$0xff] }
  0x31   :  { %485 = vmatprep.subr.bf16.mxu0 %v600_v1  ;;  %v495_v42 = vpack.c.bf16 %v65_v41, %v64_v40  ;;  %v498_v45 = vpack.c.bf16 %v67_v44, %v66_v43  ;;  %v68_v46 = vld [vmem:[#allocation5 + $0xe8] sm:$0xff]  ;;  %v69_v47 = vld [vmem:[#allocation5 + $0xf0] sm:$0xff]  ;;  %v70_v58 = vld [vmem:[#allocation5 + $0xf8] sm:$0xff]  ;;  %517 = vset.pattern.permute.xlu1 %v602_v9 }
  0x32   :  { %v501_v48 = vpack.c.bf16 %v69_v47, %v68_v46  ;;  %v72_v52 = vld [vmem:[#allocation5 + $0x108] sm:$0xff]  ;;  %v71_v59 = vld [vmem:[#allocation5 + $0x100] sm:$0xff]  ;;  %516 = vset.pattern.permute.xlu0 %v602_v9 }
  0x33   :  { %466 = vmatpush3.bf16.msra.mxu1 %v465_v12  ;;  %v76_v53 = vrot.slane %v72_v52, %v75_v51  ;;  %v504_v60 = vpack.c.bf16 %v71_v59, %v70_v58  ;;  %v155_v62 = vrot.slane %v72_v52, %v154_v61  ;;  %v230_v4 = vrot.slane %v72_v52, %v229_v3 }
  0x34   :  { %467 = vmatprep.subr.bf16.mxu1 %v600_v1  ;;  %487 = vmatpush3.bf16.msra.mxu0 %v486_v33 }
  0x35   :  { %488 = vmatprep.subr.bf16.mxu0 %v600_v1 }
  0x37   :  { %469 = vmatpush3.bf16.msra.mxu1 %v468_v15 }
  0x38   :  { %470 = vmatprep.subr.bf16.mxu1 %v600_v1  ;;  %490 = vmatpush3.bf16.msra.mxu0 %v489_v36 }
  0x39   :  { %491 = vmatprep.subr.bf16.mxu0 %v600_v1 }
  0x3b   :  { %472 = vmatpush3.bf16.msra.mxu1 %v471_v18 }
  0x3c   :  { %473 = vmatprep.subr.bf16.mxu1 %v600_v1  ;;  %493 = vmatpush3.bf16.msra.mxu0 %v492_v39 }
  0x3d   :  { %494 = vmatprep.subr.bf16.mxu0 %v600_v1 }
  0x3f   :  { %475 = vmatpush3.bf16.msra.mxu1 %v474_v21 }
  0x40   :  { %476 = vmatprep.subr.bf16.mxu1 %v600_v1  ;;  %496 = vmatpush3.bf16.msra.mxu0 %v495_v42 }
  0x41   :  { %497 = vmatprep.subr.bf16.mxu0 %v600_v1 }
  0x43   :  { %478 = vmatpush3.bf16.msra.mxu1 %v477_v24 }
  0x44   :  { %479 = vmatprep.subr.bf16.mxu1 %v600_v1  ;;  %499 = vmatpush3.bf16.msra.mxu0 %v498_v45 }
  0x45   :  { %500 = vmatprep.subr.bf16.mxu0 %v600_v1 }
  0x47   :  { %481 = vmatpush3.bf16.msra.mxu1 %v480_v27 }
  0x48   :  { %502 = vmatpush3.bf16.msra.mxu0 %v501_v48 }
  0x49   :  { %503 = vmatprep.subr.bf16.mxu0 %v600_v1 }
  0x4c   :  { %505 = vmatpush3.bf16.msra.mxu0 %v504_v60 }
  0xfd   :  { %v147_v54 = vpop.f32.mrb[0].mxu0 }
  0xfe   :  { %v148_v55 = vadd.f32 %v147_v54, %v76_v53  ;;  %v387_v56 = vpop.f32.mrb[1].mxu0 }
 0x100   :  { %v151_v57 = vmax.f32 %v148_v55, 0.0 }
 0x102   :  { %421 = vmatmul.mubr.f32.vlgmr.msra.gmra.mrb[0].mxu1 %v151_v57 }
 0x1d5   :  { %v222_v63 = vpop.f32.mrb[0].mxu1 }
 0x1d6   :  { %v223_v0 = vadd.f32 %v222_v63, %v155_v62  ;;  %v422_v2 = vpop.f32.mrb[1].mxu1 }
 0x1d8   :  { %v226_v1 = vmax.f32 %v223_v0, 0.0 }
 0x1da   :  { %456 = vmatmul.mubr.f32.vlgmr.msra.gmra.mrb[2].mxu0 %v226_v1 }
 0x2ad   :  { %v297_v5 = vpop.f32.mrb[2].mxu0 }
 0x2ae   :  { %v298_v6 = vadd.f32 %v297_v5, %v230_v4  ;;  %v457_v7 = vpop.f32.mrb[3].mxu0 }
 0x2b0   :  { %v301_v8 = vmax.f32 %v298_v6, 0.0 }
 0x2b2   :  { %303 = vrot.lane.b32.xlu0 %v301_v8, %s601_s1 }
 0x324   :  { %v304_v10 = vpop.permute.xlu0 %303 }
 0x325   :  { %v306_v11 = vsub.f32 %v301_v8, %v304_v10 }
 0x327   :  { %v307_v12 = vmul.f32 1.442695, %v306_v11 }
 0x329   :  { %518 = vpow2.f32 %v307_v12 }
 0x333   :  { %v519_v13 = vpop.eup %518 }
 0x334   :  { %v309_v14 = vadd.f32 1.0, %v519_v13 }
 0x336   :  { %520 = vrcp.f32 %v309_v14 }
 0x340   :  { %v521_v15 = vpop.eup %520 }
 0x341   :  { %325 = vperm.xlu1 %517, %v521_v15   ;;  %v312_v16 = vsub.f32 1.0, %v521_v15 }
 0x343   :  { %319 = vperm.xlu0 %516, %v312_v16  }
 0x3c0   :  { %v326_v19 = vpop.permute.xlu1 %325 }
 0x3c2   :  { %v320_v18 = vpop.permute.xlu0 %319 }
 0x3c3   :  { %v322_v20 = vsel %vm316_vm2, %v320_v18, 0.0 }
 0x3c4   :  { %v328_v21 = vsel %vm315_vm3, %v326_v19, %v322_v20 }
 0x3c5   :  { %329 = vst.msk [vmem:[#allocation7] sm:$0xff] %vm77_vm1, %v328_v21 }
 0x3c6   :  { %577 = shalt.err (!%p574_p6)
}
 0x3c7   :  { %s578_s11 = scalar_lea.hbm %s685_s2, 128 }
 0x3c8   :  { %p579_p7 = scmp.ne.s32.totalorder %s685_s2, %s578_s11  ;;  %p582_p8 = scmp.lt.u32.totalorder %s578_s11, %s685_s2 }
 0x3ca   :  { %p584_p9 = pnand %p582_p8, %p579_p7 }
 0x3cc   :  { %587 = shalt.err (!%p584_p9)
}
 0x3cd   :  { %339 = dma.vmem_to_hbm [thread:$0]  %s337_s7, 128, %s685_s2, [#allocation4]  }
 0x3ce   :  { %592 = dma.done.wait [#allocation4], 128  }
 0x3cf   :  { %593 = vsyncadd [#allocation4], 4294967168 }
 0x3d0   :  { %343 = vsyncpa [#allocation3], 1 }
 0x3d1   :  { %344 = vsyncpa [#allocation6], 1 }
 0x3d2   :  { %345 = vsyncpa [#allocation4], 1 }

</bundles_post_ra>
